<compile_context>
chip_gen: v7x
topology: tpu7x:2x2x1
jax: 0.10.0
libtpu: 0.0.40
codegen_flags: <defaults>
</compile_context>

<pallas_src>
import functools
import math

import jax
import jax.numpy as jnp
from jax.experimental import pallas as pl
from jax.experimental.pallas import tpu as pltpu

C_PAD = 128                      # lane-dense feature width for every layer
BIAS_LANE = C_PAD - 1            # "ones" lane carrying the folded standardization offset
VMEM_LIMIT = 32 * 1024 * 1024    # explicit scoped-VMEM budget (safe on v5e/v6e/v7x)


def _round_up(x, m):
    return ((x + m - 1) // m) * m


def _pad_and_tiles(n):
    """Pad node count and pick (n_pad, row tile tm, contraction tile tk)."""
    if n <= 512:
        n_pad = _round_up(n, 128)
        return n_pad, n_pad, n_pad
    n_pad = _round_up(n, 512)
    return n_pad, 512, 512


# ------------- fused layer kernel: out = (A_hat @ h_aug) @ W_eff (+ ReLU) -------------
def _gcn_layer_kernel(a_ref, h_ref, w_ref, o_ref, acc_ref, *, tk, apply_relu):
    k = pl.program_id(1)

    @pl.when(k == 0)
    def _():
        acc_ref[...] = jnp.zeros_like(acc_ref)

    # acc += A_tile @ h_slice   (h is VMEM-resident; slice the contraction window)
    off = pl.multiple_of(k * tk, tk)
    acc_ref[...] += jnp.dot(a_ref[...], h_ref[pl.ds(off, tk), :],
                            preferred_element_type=jnp.float32)

    @pl.when(k == pl.num_programs(1) - 1)
    def _():
        # Epilogue: apply the (standardization-folded) layer weight, then ReLU.
        out = jnp.dot(acc_ref[...].astype(jnp.bfloat16), w_ref[...],
                      preferred_element_type=jnp.float32)
        if apply_relu:
            out = jnp.maximum(out, 0.0)
        o_ref[...] = out.astype(o_ref.dtype)


def gcn_layer(a_pad, h_aug, w_eff, tm, tk, apply_relu, out_dtype):
    n_pad = a_pad.shape[0]
    kern = functools.partial(_gcn_layer_kernel, tk=tk, apply_relu=apply_relu)
    return pl.pallas_call(
        kern,
        out_shape=jax.ShapeDtypeStruct((n_pad, C_PAD), out_dtype),
        grid_spec=pltpu.PrefetchScalarGridSpec(
            num_scalar_prefetch=0,
            grid=(n_pad // tm, n_pad // tk),
            in_specs=[
                pl.BlockSpec((tm, tk), lambda i, k: (i, k)),          # A_hat tile (bf16)
                pl.BlockSpec((n_pad, C_PAD), lambda i, k: (0, 0)),    # h_aug, VMEM-resident
                pl.BlockSpec((C_PAD, C_PAD), lambda i, k: (0, 0)),    # folded weight (bf16)
            ],
            out_specs=pl.BlockSpec((tm, C_PAD), lambda i, k: (i, 0)),
            scratch_shapes=[pltpu.VMEM((tm, C_PAD), jnp.float32)],    # fp32 accumulator
        ),
        compiler_params=pltpu.CompilerParams(
            dimension_semantics=("parallel", "arbitrary"),
            vmem_limit_bytes=VMEM_LIMIT),
    )(a_pad, h_aug, w_eff)


# ------------------------------------ wrappers ------------------------------------
def normalize_adjacency(adj):
    """add_self_loops + symmetric normalization: D^{-1/2} (A + I) D^{-1/2}."""
    # TODO(synk): `add_self_loops` / `normalize_laplacian_sparse` are not defined in
    # the reference source; using the canonical GCN renormalization trick.
    n = adj.shape[0]
    a = adj.astype(jnp.float32) + jnp.eye(n, dtype=jnp.float32)
    deg = jnp.sum(a, axis=1)
    d_inv_sqrt = jnp.where(deg > 0, 1.0 / jnp.sqrt(deg), 0.0)
    return a * d_inv_sqrt[:, None] * d_inv_sqrt[None, :]


def xavier_uniform(key, fan_in, fan_out):
    bound = math.sqrt(6.0 / (fan_in + fan_out))
    return jax.random.uniform(key, (fan_in, fan_out), jnp.float32, -bound, bound)


def init_gcn_params(key, in_features, hidden_dims):
    dims = [in_features] + list(hidden_dims)
    keys = jax.random.split(key, len(dims) - 1)
    return [xavier_uniform(k, dims[i], dims[i + 1]) for i, k in enumerate(keys)]


def gcn_forward(x, adjacency, weights, dropout=0.0):
    """Matches GCN.forward. dropout=0.0 (module default) -> identity."""
    n = x.shape[0]
    n_pad, tm, tk = _pad_and_tiles(n)

    # Normalized adjacency computed once, zero-padded, cast to bf16 (reused by all layers).
    a_hat = normalize_adjacency(adjacency)
    a_pad = jnp.zeros((n_pad, n_pad), jnp.float32).at[:n, :n].set(a_hat)
    a_pad = a_pad.astype(jnp.bfloat16)

    c_in0 = x.shape[1]
    assert max([c_in0] + [w.shape[1] for w in weights]) < BIAS_LANE
    h_pad = jnp.zeros((n_pad, C_PAD), jnp.bfloat16).at[:n, :c_in0].set(
        x.astype(jnp.bfloat16))

    logits = None
    num_layers = len(weights)
    for li, w in enumerate(weights):
        is_last = li == num_layers - 1
        c_in, c_out = w.shape

        # Global standardization stats over the real (unpadded) activations,
        # matching torch: mean over all elements, unbiased std, no epsilon.
        h_valid = h_pad[:n, :c_in].astype(jnp.float32)
        mean = jnp.mean(h_valid)
        var = jnp.sum((h_valid - mean) ** 2) / max(h_valid.size - 1, 1)
        rstd = jax.lax.rsqrt(var)

        # Fold standardization into the weights:
        #   ((h - mean) * rstd) @ W == h @ (rstd * W) + 1 * (-mean * rstd) * (1^T W)
        # The constant term rides on the "ones" lane of h (BIAS_LANE) as an extra
        # row of the effective weight, so the kernel is a pure matmul chain.
        w_pad = jnp.zeros((C_PAD, C_PAD), jnp.float32).at[:c_in, :c_out].set(w)
        bias_row = -mean * rstd * jnp.sum(w_pad, axis=0)          # zero outside [:c_out]
        w_eff = (rstd * w_pad).at[BIAS_LANE, :].set(bias_row).astype(jnp.bfloat16)

        # Ones lane (padded node rows are neutralized by zero A_hat columns).
        h_aug = h_pad.at[:, BIAS_LANE].set(jnp.ones((n_pad,), h_pad.dtype))

        out_dtype = jnp.float32 if is_last else jnp.bfloat16
        out_pad = gcn_layer(a_pad, h_aug, w_eff, tm, tk,
                            apply_relu=not is_last, out_dtype=out_dtype)

        if is_last:
            logits = out_pad[:n, :c_out]
        else:
            # Padded rows/cols of out_pad are exactly zero, so it is reused directly.
            h_pad = out_pad
        # F.dropout with p=0.0 (module default) is the identity.
        # TODO(synk): nonzero dropout not implemented (module default is 0.0).

    # torch.cuda.memory_allocated() has no TPU equivalent; report 0.0 MiB.
    memory_alloc = 0.0
    return logits, memory_alloc


if __name__ == "__main__":
    key = jax.random.PRNGKey(0)
    k_x, k_a, k_w = jax.random.split(key, 3)

    num_nodes = 16
    in_features = 8
    hidden_dims = [32, 16, 8]

    x = jax.random.normal(k_x, (num_nodes, in_features), jnp.float32)

    # random symmetric 0/1 adjacency with no self loops
    a_rand = jax.random.bernoulli(k_a, 0.3, (num_nodes, num_nodes))
    adj = jnp.logical_or(a_rand, a_rand.T).astype(jnp.float32)
    adj = adj * (1.0 - jnp.eye(num_nodes, dtype=jnp.float32))

    weights = init_gcn_params(k_w, in_features, hidden_dims)

    fwd = jax.jit(gcn_forward)
    logits, mem = fwd(x, adj, weights)
    jax.block_until_ready(logits)
    assert logits.shape == (num_nodes, hidden_dims[-1])
    assert bool(jnp.all(jnp.isfinite(logits)))
    print("KERNEL_OK")
</pallas_src>

<mosaic_0001>
module attributes {stable_mosaic.version = 11 : i64} {
  func.func @_gcn_layer_kernel(%arg0: i32, %arg1: i32, %arg2: memref<128x128xbf16, #tpu.memory_space<vmem>>, %arg3: memref<128x128xbf16, #tpu.memory_space<vmem>>, %arg4: memref<128x128xbf16, #tpu.memory_space<vmem>>, %arg5: memref<128x128xbf16, #tpu.memory_space<vmem>>, %arg6: memref<128x128xf32, #tpu.memory_space<vmem>>) attributes {dimension_semantics = [#tpu.dimension_semantics<parallel>, #tpu.dimension_semantics<arbitrary>], iteration_bounds = array<i64: 1, 1>, scalar_prefetch = 0 : i64, scratch_operands = 1 : i64, tpu.core_type = #tpu.core_type<tc>, window_params = [{transform_indices = @transform_0, window_bounds = array<i64: 128, 128>}, {pipeline_mode = #tpu.pipeline_mode<synchronous>, transform_indices = @transform_1, window_bounds = array<i64: 128, 128>}, {pipeline_mode = #tpu.pipeline_mode<synchronous>, transform_indices = @transform_2, window_bounds = array<i64: 128, 128>}, {transform_indices = @transform_3, window_bounds = array<i64: 128, 128>}]} {
    %c0_i32 = arith.constant 0 : i32
    %0 = arith.cmpi eq, %arg1, %c0_i32 : i32
    %1 = arith.extui %0 : i1 to i32
    %c0_i32_0 = arith.constant 0 : i32
    %2 = arith.cmpi ne, %1, %c0_i32_0 : i32
    scf.if %2 {
      %cst_9 = arith.constant 0.000000e+00 : f32
      %15 = vector.broadcast %cst_9 : f32 to vector<128x128xf32>
      %c0_10 = arith.constant 0 : index
      %c0_11 = arith.constant 0 : index
      %16 = vector.load %arg6[%c0_10, %c0_11] : memref<128x128xf32, #tpu.memory_space<vmem>>, vector<128x128xf32>
      tpu.vector_store %arg6[%c0_10, %c0_11], %15 {strides = array<i32>} : memref<128x128xf32, #tpu.memory_space<vmem>>, vector<128x128xf32>,
    } else {
    }
    %c128_i32 = arith.constant 128 : i32
    %3 = arith.muli %arg1, %c128_i32 : i32
    %4 = tpu.assume_multiple %3, 128 : i32
    %c0 = arith.constant 0 : index
    %c0_1 = arith.constant 0 : index
    %5 = vector.load %arg6[%c0, %c0_1] : memref<128x128xf32, #tpu.memory_space<vmem>>, vector<128x128xf32>
    %c0_2 = arith.constant 0 : index
    %c0_3 = arith.constant 0 : index
    %6 = vector.load %arg2[%c0_2, %c0_3] : memref<128x128xbf16, #tpu.memory_space<vmem>>, vector<128x128xbf16>
    %7 = arith.index_cast %4 : i32 to index
    %c0_4 = arith.constant 0 : index
    %8 = vector.load %arg3[%7, %c0_4] : memref<128x128xbf16, #tpu.memory_space<vmem>>, vector<128x128xbf16>
    %cst = arith.constant dense<0.000000e+00> : vector<128x128xf32>
    %9 = tpu.matmul %6, %8, %cst {dimension_numbers = #tpu.dot_dimension_numbers<[1], [0], [0], [1], [0, 0, 1, 1], [], []>} : vector<128x128xbf16>, vector<128x128xbf16>, vector<128x128xf32> -> vector<128x128xf32>
    %10 = arith.addf %5, %9 : vector<128x128xf32>
    %c0_5 = arith.constant 0 : index
    %c0_6 = arith.constant 0 : index
    %11 = vector.load %arg6[%c0_5, %c0_6] : memref<128x128xf32, #tpu.memory_space<vmem>>, vector<128x128xf32>
    tpu.vector_store %arg6[%c0_5, %c0_6], %10 {strides = array<i32>} : memref<128x128xf32, #tpu.memory_space<vmem>>, vector<128x128xf32>,
    %c0_i32_7 = arith.constant 0 : i32
    %12 = arith.cmpi eq, %arg1, %c0_i32_7 : i32
    %13 = arith.extui %12 : i1 to i32
    %c0_i32_8 = arith.constant 0 : i32
    %14 = arith.cmpi ne, %13, %c0_i32_8 : i32
    scf.if %14 {
      %c0_9 = arith.constant 0 : index
      %c0_10 = arith.constant 0 : index
      %15 = vector.load %arg6[%c0_9, %c0_10] : memref<128x128xf32, #tpu.memory_space<vmem>>, vector<128x128xf32>
      %16 = arith.truncf %15 : vector<128x128xf32> to vector<128x128xbf16>
      %c0_11 = arith.constant 0 : index
      %c0_12 = arith.constant 0 : index
      %17 = vector.load %arg4[%c0_11, %c0_12] : memref<128x128xbf16, #tpu.memory_space<vmem>>, vector<128x128xbf16>
      %cst_13 = arith.constant dense<0.000000e+00> : vector<128x128xf32>
      %18 = tpu.matmul %16, %17, %cst_13 {dimension_numbers = #tpu.dot_dimension_numbers<[1], [0], [0], [1], [0, 0, 1, 1], [], []>} : vector<128x128xbf16>, vector<128x128xbf16>, vector<128x128xf32> -> vector<128x128xf32>
      %cst_14 = arith.constant 0.000000e+00 : f32
      %19 = vector.broadcast %cst_14 : f32 to vector<128x128xf32>
      %20 = arith.maximumf %18, %19 : vector<128x128xf32>
      %21 = arith.truncf %20 : vector<128x128xf32> to vector<128x128xbf16>
      %c0_15 = arith.constant 0 : index
      %c0_16 = arith.constant 0 : index
      %22 = vector.load %arg5[%c0_15, %c0_16] : memref<128x128xbf16, #tpu.memory_space<vmem>>, vector<128x128xbf16>
      tpu.vector_store %arg5[%c0_15, %c0_16], %21 {strides = array<i32>} : memref<128x128xbf16, #tpu.memory_space<vmem>>, vector<128x128xbf16>,
    } else {
    }
    return
  }
  func.func @transform_0(%arg0: i32, %arg1: i32) -> (i32, i32) {
    %c0_i32 = arith.constant 0 : i32
    return %arg0, %arg1 : i32, i32
  }
  func.func @transform_1(%arg0: i32, %arg1: i32) -> (i32, i32) {
    %c0_i32 = arith.constant 0 : i32
    %c0_i32_0 = arith.constant 0 : i32
    %c0_i32_1 = arith.constant 0 : i32
    return %c0_i32, %c0_i32_0 : i32, i32
  }
  func.func @transform_2(%arg0: i32, %arg1: i32) -> (i32, i32) {
    %c0_i32 = arith.constant 0 : i32
    %c0_i32_0 = arith.constant 0 : i32
    %c0_i32_1 = arith.constant 0 : i32
    return %c0_i32, %c0_i32_0 : i32, i32
  }
  func.func @transform_3(%arg0: i32, %arg1: i32) -> (i32, i32) {
    %c0_i32 = arith.constant 0 : i32
    %c0_i32_0 = arith.constant 0 : i32
    return %arg0, %c0_i32 : i32, i32
  }
}

module attributes {stable_mosaic.version = 11 : i64} {
  func.func @_gcn_layer_kernel(%arg0: i32, %arg1: i32, %arg2: memref<128x128xbf16, #tpu.memory_space<vmem>>, %arg3: memref<128x128xbf16, #tpu.memory_space<vmem>>, %arg4: memref<128x128xbf16, #tpu.memory_space<vmem>>, %arg5: memref<128x128xf32, #tpu.memory_space<vmem>>, %arg6: memref<128x128xf32, #tpu.memory_space<vmem>>) attributes {dimension_semantics = [#tpu.dimension_semantics<parallel>, #tpu.dimension_semantics<arbitrary>], iteration_bounds = array<i64: 1, 1>, scalar_prefetch = 0 : i64, scratch_operands = 1 : i64, tpu.core_type = #tpu.core_type<tc>, window_params = [{transform_indices = @transform_0, window_bounds = array<i64: 128, 128>}, {pipeline_mode = #tpu.pipeline_mode<synchronous>, transform_indices = @transform_1, window_bounds = array<i64: 128, 128>}, {pipeline_mode = #tpu.pipeline_mode<synchronous>, transform_indices = @transform_2, window_bounds = array<i64: 128, 128>}, {transform_indices = @transform_3, window_bounds = array<i64: 128, 128>}]} {
    %c0_i32 = arith.constant 0 : i32
    %0 = arith.cmpi eq, %arg1, %c0_i32 : i32
    %1 = arith.extui %0 : i1 to i32
    %c0_i32_0 = arith.constant 0 : i32
    %2 = arith.cmpi ne, %1, %c0_i32_0 : i32
    scf.if %2 {
      %cst_9 = arith.constant 0.000000e+00 : f32
      %15 = vector.broadcast %cst_9 : f32 to vector<128x128xf32>
      %c0_10 = arith.constant 0 : index
      %c0_11 = arith.constant 0 : index
      %16 = vector.load %arg6[%c0_10, %c0_11] : memref<128x128xf32, #tpu.memory_space<vmem>>, vector<128x128xf32>
      tpu.vector_store %arg6[%c0_10, %c0_11], %15 {strides = array<i32>} : memref<128x128xf32, #tpu.memory_space<vmem>>, vector<128x128xf32>,
    } else {
    }
    %c128_i32 = arith.constant 128 : i32
    %3 = arith.muli %arg1, %c128_i32 : i32
    %4 = tpu.assume_multiple %3, 128 : i32
    %c0 = arith.constant 0 : index
    %c0_1 = arith.constant 0 : index
    %5 = vector.load %arg6[%c0, %c0_1] : memref<128x128xf32, #tpu.memory_space<vmem>>, vector<128x128xf32>
    %c0_2 = arith.constant 0 : index
    %c0_3 = arith.constant 0 : index
    %6 = vector.load %arg2[%c0_2, %c0_3] : memref<128x128xbf16, #tpu.memory_space<vmem>>, vector<128x128xbf16>
    %7 = arith.index_cast %4 : i32 to index
    %c0_4 = arith.constant 0 : index
    %8 = vector.load %arg3[%7, %c0_4] : memref<128x128xbf16, #tpu.memory_space<vmem>>, vector<128x128xbf16>
    %cst = arith.constant dense<0.000000e+00> : vector<128x128xf32>
    %9 = tpu.matmul %6, %8, %cst {dimension_numbers = #tpu.dot_dimension_numbers<[1], [0], [0], [1], [0, 0, 1, 1], [], []>} : vector<128x128xbf16>, vector<128x128xbf16>, vector<128x128xf32> -> vector<128x128xf32>
    %10 = arith.addf %5, %9 : vector<128x128xf32>
    %c0_5 = arith.constant 0 : index
    %c0_6 = arith.constant 0 : index
    %11 = vector.load %arg6[%c0_5, %c0_6] : memref<128x128xf32, #tpu.memory_space<vmem>>, vector<128x128xf32>
    tpu.vector_store %arg6[%c0_5, %c0_6], %10 {strides = array<i32>} : memref<128x128xf32, #tpu.memory_space<vmem>>, vector<128x128xf32>,
    %c0_i32_7 = arith.constant 0 : i32
    %12 = arith.cmpi eq, %arg1, %c0_i32_7 : i32
    %13 = arith.extui %12 : i1 to i32
    %c0_i32_8 = arith.constant 0 : i32
    %14 = arith.cmpi ne, %13, %c0_i32_8 : i32
    scf.if %14 {
      %c0_9 = arith.constant 0 : index
      %c0_10 = arith.constant 0 : index
      %15 = vector.load %arg6[%c0_9, %c0_10] : memref<128x128xf32, #tpu.memory_space<vmem>>, vector<128x128xf32>
      %16 = arith.truncf %15 : vector<128x128xf32> to vector<128x128xbf16>
      %c0_11 = arith.constant 0 : index
      %c0_12 = arith.constant 0 : index
      %17 = vector.load %arg4[%c0_11, %c0_12] : memref<128x128xbf16, #tpu.memory_space<vmem>>, vector<128x128xbf16>
      %cst_13 = arith.constant dense<0.000000e+00> : vector<128x128xf32>
      %18 = tpu.matmul %16, %17, %cst_13 {dimension_numbers = #tpu.dot_dimension_numbers<[1], [0], [0], [1], [0, 0, 1, 1], [], []>} : vector<128x128xbf16>, vector<128x128xbf16>, vector<128x128xf32> -> vector<128x128xf32>
      %c0_14 = arith.constant 0 : index
      %c0_15 = arith.constant 0 : index
      %19 = vector.load %arg5[%c0_14, %c0_15] : memref<128x128xf32, #tpu.memory_space<vmem>>, vector<128x128xf32>
      tpu.vector_store %arg5[%c0_14, %c0_15], %18 {strides = array<i32>} : memref<128x128xf32, #tpu.memory_space<vmem>>, vector<128x128xf32>,
    } else {
    }
    return
  }
  func.func @transform_0(%arg0: i32, %arg1: i32) -> (i32, i32) {
    %c0_i32 = arith.constant 0 : i32
    return %arg0, %arg1 : i32, i32
  }
  func.func @transform_1(%arg0: i32, %arg1: i32) -> (i32, i32) {
    %c0_i32 = arith.constant 0 : i32
    %c0_i32_0 = arith.constant 0 : i32
    %c0_i32_1 = arith.constant 0 : i32
    return %c0_i32, %c0_i32_0 : i32, i32
  }
  func.func @transform_2(%arg0: i32, %arg1: i32) -> (i32, i32) {
    %c0_i32 = arith.constant 0 : i32
    %c0_i32_0 = arith.constant 0 : i32
    %c0_i32_1 = arith.constant 0 : i32
    return %c0_i32, %c0_i32_0 : i32, i32
  }
  func.func @transform_3(%arg0: i32, %arg1: i32) -> (i32, i32) {
    %c0_i32 = arith.constant 0 : i32
    %c0_i32_0 = arith.constant 0 : i32
    return %arg0, %c0_i32 : i32, i32
  }
}

</mosaic_0001>

<bundles_post_ra>
// kernel: gcn_forward.5
= control target key start
LH: loop header
LB: loop body
LE: loop exit
PB: predicated region body
PF: predicated region fallthrough
CT: control target
= control target key end

     0   :  { %s807_s1 = inlined_call_operand.vmem [shape: bf16[128,128], index: 1, kind: input, shape index: {}]   ;;  %s808_s0 = inlined_call_operand.vmem [shape: bf16[128,128], index: 0, kind: input, shape index: {}]   ;;  %s809_s2 = inlined_call_operand.vmem [shape: bf16[128,128], index: 2, kind: input, shape index: {}]   ;;  %s810_s3 = inlined_call_operand.vmem [shape: f32[128,128], index: 3, kind: output, shape index: {}]  }
   0x1   :  { %v643_v0 = vld [vmem:[%s807_s1] sm:$0xff]   ;;  %v644_v1 = vld [vmem:[%s807_s1 + $0x8] sm:$0xff]   ;;  %v645_v2 = vld [vmem:[%s807_s1 + $0x10] sm:$0xff]  }
   0x2   :  { %579 = vmatprep.subr.bf16.mxu0 %v643_v0  ;;  %v646_v3 = vld [vmem:[%s807_s1 + $0x18] sm:$0xff]   ;;  %v651_v4 = vld [vmem:[%s808_s0] sm:$0xff]   ;;  %v648_v6 = vld [vmem:[%s807_s1 + $0x28] sm:$0xff]  }
   0x3   :  { %580 = vmatpush3.bf16.msra.mxu0 %v643_v0  ;;  %595 = vmatprep.mubr.bf16.mxu0 %v651_v4  ;;  %v647_v5 = vld [vmem:[%s807_s1 + $0x20] sm:$0xff]   ;;  %v660_v8 = vld [vmem:[%s809_s2 + $0x8] sm:$0xff]   ;;  %v649_v9 = vld [vmem:[%s807_s1 + $0x30] sm:$0xff]  }
   0x4   :  { %581 = vmatprep.subr.bf16.mxu0 %v644_v1  ;;  %v659_v7 = vld [vmem:[%s809_s2] sm:$0xff]   ;;  %v661_v10 = vld [vmem:[%s809_s2 + $0x10] sm:$0xff]   ;;  %v650_v11 = vld [vmem:[%s807_s1 + $0x38] sm:$0xff]  }
   0x5   :  { %611 = vmatprep.subr.bf16.mxu1 %v659_v7  ;;  %v662_v12 = vld [vmem:[%s809_s2 + $0x18] sm:$0xff]   ;;  %v663_v13 = vld [vmem:[%s809_s2 + $0x20] sm:$0xff]   ;;  %v652_v14 = vld [vmem:[%s808_s0 + $0x8] sm:$0xff]  }
   0x6   :  { %612 = vmatpush3.bf16.msra.mxu1 %v659_v7  ;;  %v653_v15 = vld [vmem:[%s808_s0 + $0x10] sm:$0xff]   ;;  %v664_v16 = vld [vmem:[%s809_s2 + $0x28] sm:$0xff]   ;;  %v654_v18 = vld [vmem:[%s808_s0 + $0x18] sm:$0xff]  }
   0x7   :  { %582 = vmatpush3.bf16.msra.mxu0 %v644_v1  ;;  %613 = vmatprep.subr.bf16.mxu1 %v660_v8  ;;  %v665_v17 = vld [vmem:[%s809_s2 + $0x30] sm:$0xff]   ;;  %v655_v19 = vld [vmem:[%s808_s0 + $0x20] sm:$0xff]   ;;  %v656_v20 = vld [vmem:[%s808_s0 + $0x28] sm:$0xff]  }
   0x8   :  { %583 = vmatprep.subr.bf16.mxu0 %v645_v2  ;;  %v657_v21 = vld [vmem:[%s808_s0 + $0x30] sm:$0xff]   ;;  %v658_v22 = vld [vmem:[%s808_s0 + $0x38] sm:$0xff]  }
   0x9   :  { %v666_v23 = vld [vmem:[%s809_s2 + $0x38] sm:$0xff]  }
   0xa   :  { %614 = vmatpush3.bf16.msra.mxu1 %v660_v8 }
   0xb   :  { %584 = vmatpush3.bf16.msra.mxu0 %v645_v2  ;;  %615 = vmatprep.subr.bf16.mxu1 %v661_v10 }
   0xc   :  { %585 = vmatprep.subr.bf16.mxu0 %v646_v3 }
   0xe   :  { %616 = vmatpush3.bf16.msra.mxu1 %v661_v10 }
   0xf   :  { %586 = vmatpush3.bf16.msra.mxu0 %v646_v3  ;;  %617 = vmatprep.subr.bf16.mxu1 %v662_v12 }
  0x10   :  { %587 = vmatprep.subr.bf16.mxu0 %v647_v5 }
  0x12   :  { %618 = vmatpush3.bf16.msra.mxu1 %v662_v12 }
  0x13   :  { %588 = vmatpush3.bf16.msra.mxu0 %v647_v5  ;;  %619 = vmatprep.subr.bf16.mxu1 %v663_v13 }
  0x14   :  { %589 = vmatprep.subr.bf16.mxu0 %v648_v6 }
  0x16   :  { %620 = vmatpush3.bf16.msra.mxu1 %v663_v13 }
  0x17   :  { %590 = vmatpush3.bf16.msra.mxu0 %v648_v6  ;;  %621 = vmatprep.subr.bf16.mxu1 %v664_v16 }
  0x18   :  { %591 = vmatprep.subr.bf16.mxu0 %v649_v9 }
  0x1a   :  { %622 = vmatpush3.bf16.msra.mxu1 %v664_v16 }
  0x1b   :  { %592 = vmatpush3.bf16.msra.mxu0 %v649_v9  ;;  %623 = vmatprep.subr.bf16.mxu1 %v665_v17 }
  0x1c   :  { %593 = vmatprep.subr.bf16.mxu0 %v650_v11 }
  0x1e   :  { %624 = vmatpush3.bf16.msra.mxu1 %v665_v17 }
  0x1f   :  { %594 = vmatpush3.bf16.msra.mxu0 %v650_v11  ;;  %625 = vmatprep.subr.bf16.mxu1 %v666_v23 }
  0x22   :  { %596 = vmatmul.mubr.bf16.vlgmr.msra.gmra.mrb[0].mxu0 %v652_v14  ;;  %626 = vmatpush3.bf16.msra.mxu1 %v666_v23 }
  0x23   :  { %599 = vmatprep.mubr.bf16.mxu0 %v653_v15 }
  0x2a   :  { %600 = vmatmul.mubr.bf16.gmra.mrb[4].mxu0 %v654_v18 }
  0x2b   :  { %603 = vmatprep.mubr.bf16.mxu0 %v655_v19 }
  0x32   :  { %604 = vmatmul.mubr.bf16.gmra.mrb[8].mxu0 %v656_v20 }
  0x33   :  { %607 = vmatprep.mubr.bf16.mxu0 %v657_v21 }
  0x3a   :  { %608 = vmatmul.mubr.bf16.gmra.mrb[12].mxu0 %v658_v22 }
  0xf5   :  { %v597_v24 = vpop.f32.mrb[0].mxu0 }
  0xf6   :  { %v218_v25 = vpop.f32.mrb[1].mxu0 }
  0xf7   :  { %v598_v26 = vpop.f32.mrb[2].mxu0 }
  0xf8   :  { %v333_v27 = vpack.c.bf16 %v598_v26, %v597_v24  ;;  %v221_v28 = vpop.f32.mrb[3].mxu0 }
  0xf9   :  { %v332_v29 = vpack.c.bf16 %v221_v28, %v218_v25 }
  0xfb   :  { %627 = vmatprep.mubr.bf16.mxu1 %v332_v29 }
  0xfc   :  { %628 = vmatmul.mubr.bf16.vlgmr.msra.gmra.mrb[0].mxu1 %v333_v27 }
  0xfd   :  { %v601_v30 = vpop.f32.mrb[4].mxu0 }
  0xfe   :  { %v234_v31 = vpop.f32.mrb[5].mxu0 }
  0xff   :  { %v602_v32 = vpop.f32.mrb[6].mxu0 }
 0x100   :  { %v335_v33 = vpack.c.bf16 %v602_v32, %v601_v30  ;;  %v237_v34 = vpop.f32.mrb[7].mxu0 }
 0x101   :  { %v334_v35 = vpack.c.bf16 %v237_v34, %v234_v31 }
 0x103   :  { %631 = vmatprep.mubr.bf16.mxu1 %v334_v35 }
 0x104   :  { %632 = vmatmul.mubr.bf16.gmra.mrb[4].mxu1 %v335_v33 }
 0x105   :  { %v605_v36 = vpop.f32.mrb[8].mxu0 }
 0x106   :  { %v250_v37 = vpop.f32.mrb[9].mxu0 }
 0x107   :  { %v606_v38 = vpop.f32.mrb[10].mxu0 }
 0x108   :  { %v337_v39 = vpack.c.bf16 %v606_v38, %v605_v36  ;;  %v253_v40 = vpop.f32.mrb[11].mxu0 }
 0x109   :  { %v336_v41 = vpack.c.bf16 %v253_v40, %v250_v37 }
 0x10b   :  { %635 = vmatprep.mubr.bf16.mxu1 %v336_v41 }
 0x10c   :  { %636 = vmatmul.mubr.bf16.gmra.mrb[8].mxu1 %v337_v39 }
 0x10d   :  { %v609_v42 = vpop.f32.mrb[12].mxu0 }
 0x10e   :  { %v266_v43 = vpop.f32.mrb[13].mxu0 }
 0x10f   :  { %v610_v44 = vpop.f32.mrb[14].mxu0 }
 0x110   :  { %v339_v45 = vpack.c.bf16 %v610_v44, %v609_v42  ;;  %v269_v46 = vpop.f32.mrb[15].mxu0 }
 0x111   :  { %v338_v47 = vpack.c.bf16 %v269_v46, %v266_v43 }
 0x113   :  { %639 = vmatprep.mubr.bf16.mxu1 %v338_v47 }
 0x114   :  { %640 = vmatmul.mubr.bf16.gmra.mrb[12].mxu1 %v339_v45 }
 0x1cf   :  { %v629_v48 = vpop.f32.mrb[0].mxu1 }
 0x1d0   :  { %503 = vst [vmem:[%s810_s3 + $0x10] sm:$0xff] %v629_v48  ;;  %v438_v49 = vpop.f32.mrb[1].mxu1 }
 0x1d1   :  { %501 = vst [vmem:[%s810_s3] sm:$0xff] %v438_v49  ;;  %v630_v50 = vpop.f32.mrb[2].mxu1 }
 0x1d2   :  { %504 = vst [vmem:[%s810_s3 + $0x18] sm:$0xff] %v630_v50  ;;  %v441_v51 = vpop.f32.mrb[3].mxu1 }
 0x1d3   :  { %502 = vst [vmem:[%s810_s3 + $0x8] sm:$0xff] %v441_v51 }
 0x1d7   :  { %v633_v52 = vpop.f32.mrb[4].mxu1 }
 0x1d8   :  { %507 = vst [vmem:[%s810_s3 + $0x30] sm:$0xff] %v633_v52  ;;  %v454_v53 = vpop.f32.mrb[5].mxu1 }
 0x1d9   :  { %505 = vst [vmem:[%s810_s3 + $0x20] sm:$0xff] %v454_v53  ;;  %v634_v54 = vpop.f32.mrb[6].mxu1 }
 0x1da   :  { %508 = vst [vmem:[%s810_s3 + $0x38] sm:$0xff] %v634_v54  ;;  %v457_v55 = vpop.f32.mrb[7].mxu1 }
 0x1db   :  { %506 = vst [vmem:[%s810_s3 + $0x28] sm:$0xff] %v457_v55 }
 0x1df   :  { %v637_v56 = vpop.f32.mrb[8].mxu1 }
 0x1e0   :  { %511 = vst [vmem:[%s810_s3 + $0x50] sm:$0xff] %v637_v56  ;;  %v470_v57 = vpop.f32.mrb[9].mxu1 }
 0x1e1   :  { %509 = vst [vmem:[%s810_s3 + $0x40] sm:$0xff] %v470_v57  ;;  %v638_v58 = vpop.f32.mrb[10].mxu1 }
 0x1e2   :  { %512 = vst [vmem:[%s810_s3 + $0x58] sm:$0xff] %v638_v58  ;;  %v473_v59 = vpop.f32.mrb[11].mxu1 }
 0x1e3   :  { %510 = vst [vmem:[%s810_s3 + $0x48] sm:$0xff] %v473_v59 }
 0x1e7   :  { %v641_v60 = vpop.f32.mrb[12].mxu1 }
 0x1e8   :  { %515 = vst [vmem:[%s810_s3 + $0x70] sm:$0xff] %v641_v60  ;;  %v486_v61 = vpop.f32.mrb[13].mxu1 }
 0x1e9   :  { %513 = vst [vmem:[%s810_s3 + $0x60] sm:$0xff] %v486_v61  ;;  %v642_v62 = vpop.f32.mrb[14].mxu1 }
 0x1ea   :  { %516 = vst [vmem:[%s810_s3 + $0x78] sm:$0xff] %v642_v62  ;;  %v489_v63 = vpop.f32.mrb[15].mxu1 }
 0x1eb   :  { %514 = vst [vmem:[%s810_s3 + $0x68] sm:$0xff] %v489_v63 }

// kernel: gcn_forward.3
= control target key start
LH: loop header
LB: loop body
LE: loop exit
PB: predicated region body
PF: predicated region fallthrough
CT: control target
= control target key end

     0   :  { %s942_s1 = inlined_call_operand.vmem [shape: bf16[128,128], index: 1, kind: input, shape index: {}]   ;;  %s943_s0 = inlined_call_operand.vmem [shape: bf16[128,128], index: 0, kind: input, shape index: {}]   ;;  %s944_s2 = inlined_call_operand.vmem [shape: bf16[128,128], index: 2, kind: input, shape index: {}]   ;;  %s945_s3 = inlined_call_operand.vmem [shape: bf16[128,128], index: 3, kind: output, shape index: {}]  }
   0x1   :  { %v802_v0 = vld [vmem:[%s942_s1] sm:$0xff]   ;;  %v803_v1 = vld [vmem:[%s942_s1 + $0x8] sm:$0xff]   ;;  %v804_v2 = vld [vmem:[%s942_s1 + $0x10] sm:$0xff]  }
   0x2   :  { %738 = vmatprep.subr.bf16.mxu0 %v802_v0  ;;  %v805_v3 = vld [vmem:[%s942_s1 + $0x18] sm:$0xff]   ;;  %v810_v4 = vld [vmem:[%s943_s0] sm:$0xff]   ;;  %v807_v6 = vld [vmem:[%s942_s1 + $0x28] sm:$0xff]  }
   0x3   :  { %739 = vmatpush3.bf16.msra.mxu0 %v802_v0  ;;  %754 = vmatprep.mubr.bf16.mxu0 %v810_v4  ;;  %v806_v5 = vld [vmem:[%s942_s1 + $0x20] sm:$0xff]   ;;  %v819_v8 = vld [vmem:[%s944_s2 + $0x8] sm:$0xff]   ;;  %v808_v9 = vld [vmem:[%s942_s1 + $0x30] sm:$0xff]  }
   0x4   :  { %740 = vmatprep.subr.bf16.mxu0 %v803_v1  ;;  %v818_v7 = vld [vmem:[%s944_s2] sm:$0xff]   ;;  %v820_v10 = vld [vmem:[%s944_s2 + $0x10] sm:$0xff]   ;;  %v809_v11 = vld [vmem:[%s942_s1 + $0x38] sm:$0xff]  }
   0x5   :  { %770 = vmatprep.subr.bf16.mxu1 %v818_v7  ;;  %v821_v12 = vld [vmem:[%s944_s2 + $0x18] sm:$0xff]   ;;  %v822_v13 = vld [vmem:[%s944_s2 + $0x20] sm:$0xff]   ;;  %v811_v14 = vld [vmem:[%s943_s0 + $0x8] sm:$0xff]  }
   0x6   :  { %771 = vmatpush3.bf16.msra.mxu1 %v818_v7  ;;  %v812_v15 = vld [vmem:[%s943_s0 + $0x10] sm:$0xff]   ;;  %v823_v16 = vld [vmem:[%s944_s2 + $0x28] sm:$0xff]   ;;  %v813_v18 = vld [vmem:[%s943_s0 + $0x18] sm:$0xff]  }
   0x7   :  { %741 = vmatpush3.bf16.msra.mxu0 %v803_v1  ;;  %772 = vmatprep.subr.bf16.mxu1 %v819_v8  ;;  %v824_v17 = vld [vmem:[%s944_s2 + $0x30] sm:$0xff]   ;;  %v814_v19 = vld [vmem:[%s943_s0 + $0x20] sm:$0xff]   ;;  %v815_v20 = vld [vmem:[%s943_s0 + $0x28] sm:$0xff]  }
   0x8   :  { %742 = vmatprep.subr.bf16.mxu0 %v804_v2  ;;  %v816_v21 = vld [vmem:[%s943_s0 + $0x30] sm:$0xff]   ;;  %v817_v22 = vld [vmem:[%s943_s0 + $0x38] sm:$0xff]  }
   0x9   :  { %v825_v23 = vld [vmem:[%s944_s2 + $0x38] sm:$0xff]  }
   0xa   :  { %773 = vmatpush3.bf16.msra.mxu1 %v819_v8 }
   0xb   :  { %743 = vmatpush3.bf16.msra.mxu0 %v804_v2  ;;  %774 = vmatprep.subr.bf16.mxu1 %v820_v10 }
   0xc   :  { %744 = vmatprep.subr.bf16.mxu0 %v805_v3 }
   0xe   :  { %775 = vmatpush3.bf16.msra.mxu1 %v820_v10 }
   0xf   :  { %745 = vmatpush3.bf16.msra.mxu0 %v805_v3  ;;  %776 = vmatprep.subr.bf16.mxu1 %v821_v12 }
  0x10   :  { %746 = vmatprep.subr.bf16.mxu0 %v806_v5 }
  0x12   :  { %777 = vmatpush3.bf16.msra.mxu1 %v821_v12 }
  0x13   :  { %747 = vmatpush3.bf16.msra.mxu0 %v806_v5  ;;  %778 = vmatprep.subr.bf16.mxu1 %v822_v13 }
  0x14   :  { %748 = vmatprep.subr.bf16.mxu0 %v807_v6 }
  0x16   :  { %779 = vmatpush3.bf16.msra.mxu1 %v822_v13 }
  0x17   :  { %749 = vmatpush3.bf16.msra.mxu0 %v807_v6  ;;  %780 = vmatprep.subr.bf16.mxu1 %v823_v16 }
  0x18   :  { %750 = vmatprep.subr.bf16.mxu0 %v808_v9 }
  0x1a   :  { %781 = vmatpush3.bf16.msra.mxu1 %v823_v16 }
  0x1b   :  { %751 = vmatpush3.bf16.msra.mxu0 %v808_v9  ;;  %782 = vmatprep.subr.bf16.mxu1 %v824_v17 }
  0x1c   :  { %752 = vmatprep.subr.bf16.mxu0 %v809_v11 }
  0x1e   :  { %783 = vmatpush3.bf16.msra.mxu1 %v824_v17 }
  0x1f   :  { %753 = vmatpush3.bf16.msra.mxu0 %v809_v11  ;;  %784 = vmatprep.subr.bf16.mxu1 %v825_v23 }
  0x22   :  { %755 = vmatmul.mubr.bf16.vlgmr.msra.gmra.mrb[0].mxu0 %v811_v14  ;;  %785 = vmatpush3.bf16.msra.mxu1 %v825_v23 }
  0x23   :  { %758 = vmatprep.mubr.bf16.mxu0 %v812_v15 }
  0x2a   :  { %759 = vmatmul.mubr.bf16.gmra.mrb[4].mxu0 %v813_v18 }
  0x2b   :  { %762 = vmatprep.mubr.bf16.mxu0 %v814_v19 }
  0x32   :  { %763 = vmatmul.mubr.bf16.gmra.mrb[8].mxu0 %v815_v20 }
  0x33   :  { %766 = vmatprep.mubr.bf16.mxu0 %v816_v21 }
  0x3a   :  { %767 = vmatmul.mubr.bf16.gmra.mrb[12].mxu0 %v817_v22 }
  0xf5   :  { %v756_v24 = vpop.f32.mrb[0].mxu0 }
  0xf6   :  { %v218_v25 = vpop.f32.mrb[1].mxu0 }
  0xf7   :  { %v757_v26 = vpop.f32.mrb[2].mxu0 }
  0xf8   :  { %v333_v27 = vpack.c.bf16 %v757_v26, %v756_v24  ;;  %v221_v28 = vpop.f32.mrb[3].mxu0 }
  0xf9   :  { %v332_v29 = vpack.c.bf16 %v221_v28, %v218_v25 }
  0xfb   :  { %786 = vmatprep.mubr.bf16.mxu1 %v332_v29 }
  0xfc   :  { %787 = vmatmul.mubr.bf16.vlgmr.msra.gmra.mrb[0].mxu1 %v333_v27 }
  0xfd   :  { %v760_v30 = vpop.f32.mrb[4].mxu0 }
  0xfe   :  { %v234_v31 = vpop.f32.mrb[5].mxu0 }
  0xff   :  { %v761_v32 = vpop.f32.mrb[6].mxu0 }
 0x100   :  { %v335_v33 = vpack.c.bf16 %v761_v32, %v760_v30  ;;  %v237_v34 = vpop.f32.mrb[7].mxu0 }
 0x101   :  { %v334_v35 = vpack.c.bf16 %v237_v34, %v234_v31 }
 0x103   :  { %790 = vmatprep.mubr.bf16.mxu1 %v334_v35 }
 0x104   :  { %791 = vmatmul.mubr.bf16.gmra.mrb[4].mxu1 %v335_v33 }
 0x105   :  { %v764_v36 = vpop.f32.mrb[8].mxu0 }
 0x106   :  { %v250_v37 = vpop.f32.mrb[9].mxu0 }
 0x107   :  { %v765_v38 = vpop.f32.mrb[10].mxu0 }
 0x108   :  { %v337_v39 = vpack.c.bf16 %v765_v38, %v764_v36  ;;  %v253_v40 = vpop.f32.mrb[11].mxu0 }
 0x109   :  { %v336_v41 = vpack.c.bf16 %v253_v40, %v250_v37 }
 0x10b   :  { %794 = vmatprep.mubr.bf16.mxu1 %v336_v41 }
 0x10c   :  { %795 = vmatmul.mubr.bf16.gmra.mrb[8].mxu1 %v337_v39 }
 0x10d   :  { %v768_v42 = vpop.f32.mrb[12].mxu0 }
 0x10e   :  { %v266_v43 = vpop.f32.mrb[13].mxu0 }
 0x10f   :  { %v769_v44 = vpop.f32.mrb[14].mxu0 }
 0x110   :  { %v339_v45 = vpack.c.bf16 %v769_v44, %v768_v42  ;;  %v269_v46 = vpop.f32.mrb[15].mxu0 }
 0x111   :  { %v338_v47 = vpack.c.bf16 %v269_v46, %v266_v43 }
 0x113   :  { %798 = vmatprep.mubr.bf16.mxu1 %v338_v47 }
 0x114   :  { %799 = vmatmul.mubr.bf16.gmra.mrb[12].mxu1 %v339_v45 }
 0x1cf   :  { %v788_v48 = vpop.f32.mrb[0].mxu1 }
 0x1d0   :  { %v438_v49 = vpop.f32.mrb[1].mxu1  ;;  %v503_v51 = vmax.f32 %v788_v48, 0.0 }
 0x1d1   :  { %v789_v50 = vpop.f32.mrb[2].mxu1  ;;  %v501_v54 = vmax.f32 %v438_v49, 0.0 }
 0x1d2   :  { %v504_v52 = vmax.f32 %v789_v50, 0.0  ;;  %v441_v53 = vpop.f32.mrb[3].mxu1 }
 0x1d3   :  { %v502_v55 = vmax.f32 %v441_v53, 0.0 }
 0x1d4   :  { %v667_v56 = vpack.c.bf16 %v504_v52, %v503_v51 }
 0x1d5   :  { %v662_v57 = vpack.c.bf16 %v502_v55, %v501_v54 }
 0x1d6   :  { %699 = vst [vmem:[%s945_s3 + $0x8] sm:$0xff] %v667_v56  }
 0x1d7   :  { %663 = vst [vmem:[%s945_s3] sm:$0xff] %v662_v57   ;;  %v792_v58 = vpop.f32.mrb[4].mxu1 }
 0x1d8   :  { %v454_v59 = vpop.f32.mrb[5].mxu1  ;;  %v507_v61 = vmax.f32 %v792_v58, 0.0 }
 0x1d9   :  { %v793_v60 = vpop.f32.mrb[6].mxu1  ;;  %v505_v0 = vmax.f32 %v454_v59, 0.0 }
 0x1da   :  { %v508_v62 = vmax.f32 %v793_v60, 0.0  ;;  %v457_v63 = vpop.f32.mrb[7].mxu1 }
 0x1db   :  { %v506_v1 = vmax.f32 %v457_v63, 0.0 }
 0x1dc   :  { %v677_v2 = vpack.c.bf16 %v508_v62, %v507_v61 }
 0x1dd   :  { %v672_v3 = vpack.c.bf16 %v506_v1, %v505_v0 }
 0x1de   :  { %701 = vst [vmem:[%s945_s3 + $0x18] sm:$0xff] %v677_v2  }
 0x1df   :  { %700 = vst [vmem:[%s945_s3 + $0x10] sm:$0xff] %v672_v3   ;;  %v796_v4 = vpop.f32.mrb[8].mxu1 }
 0x1e0   :  { %v470_v5 = vpop.f32.mrb[9].mxu1  ;;  %v511_v7 = vmax.f32 %v796_v4, 0.0 }
 0x1e1   :  { %v797_v6 = vpop.f32.mrb[10].mxu1  ;;  %v509_v10 = vmax.f32 %v470_v5, 0.0 }
 0x1e2   :  { %v512_v8 = vmax.f32 %v797_v6, 0.0  ;;  %v473_v9 = vpop.f32.mrb[11].mxu1 }
 0x1e3   :  { %v510_v11 = vmax.f32 %v473_v9, 0.0 }
 0x1e4   :  { %v687_v12 = vpack.c.bf16 %v512_v8, %v511_v7 }
 0x1e5   :  { %v682_v13 = vpack.c.bf16 %v510_v11, %v509_v10 }
 0x1e6   :  { %703 = vst [vmem:[%s945_s3 + $0x28] sm:$0xff] %v687_v12  }
 0x1e7   :  { %702 = vst [vmem:[%s945_s3 + $0x20] sm:$0xff] %v682_v13   ;;  %v800_v14 = vpop.f32.mrb[12].mxu1 }
 0x1e8   :  { %v486_v15 = vpop.f32.mrb[13].mxu1  ;;  %v515_v17 = vmax.f32 %v800_v14, 0.0 }
 0x1e9   :  { %v801_v16 = vpop.f32.mrb[14].mxu1  ;;  %v513_v20 = vmax.f32 %v486_v15, 0.0 }
 0x1ea   :  { %v516_v18 = vmax.f32 %v801_v16, 0.0  ;;  %v489_v19 = vpop.f32.mrb[15].mxu1 }
 0x1eb   :  { %v514_v21 = vmax.f32 %v489_v19, 0.0 }
 0x1ec   :  { %v697_v22 = vpack.c.bf16 %v516_v18, %v515_v17 }
 0x1ed   :  { %v692_v23 = vpack.c.bf16 %v514_v21, %v513_v20 }
 0x1ee   :  { %705 = vst [vmem:[%s945_s3 + $0x38] sm:$0xff] %v697_v22  }
 0x1ef   :  { %704 = vst [vmem:[%s945_s3 + $0x30] sm:$0xff] %v692_v23  }

</bundles_post_ra>
